<compile_context>
chip_gen: v5e
topology: v5e:2x2
jax: 0.10.0
libtpu: 0.0.40
codegen_flags: <defaults>
</compile_context>

<pallas_src>
import jax
import jax.numpy as jnp
from jax.experimental import pallas as pl
from jax.experimental.pallas import tpu as pltpu


# Large tiles amortize the per-grid-step overhead; at F=16 a (2048, 128-lane-padded)
# f32 block is 1 MiB per buffer, so the double-buffered footprint stays well under
# v5e's 16 MiB default scoped VMEM and v7x's 64 MiB physical VMEM.
DEFAULT_TILE_B = 2048


def _round_up(n, m):
    return ((n + m - 1) // m) * m


# ----------------------------------------------------------------------------- kernels


def _mlp_compute(x_ref, w1_ref, b1_ref, w2_ref, b2_ref, w3_ref, b3_ref):
    """relu(relu(relu(x@W1+b1)@W2+b2)@W3+b3) for one (tile_b, F) tile.

    Matmul inputs keep the storage dtype (f32 or bf16 -> MXU-native), accumulation,
    bias add and relu are done in f32 (required on v5e where the VPU has no bf16).
    """
    x = x_ref[...]
    h1 = jnp.dot(x, w1_ref[...], preferred_element_type=jnp.float32)
    h1 = jnp.maximum(h1 + b1_ref[...].astype(jnp.float32), 0.0)
    h2 = jnp.dot(h1.astype(w2_ref.dtype), w2_ref[...], preferred_element_type=jnp.float32)
    h2 = jnp.maximum(h2 + b2_ref[...].astype(jnp.float32), 0.0)
    h3 = jnp.dot(h2.astype(w3_ref.dtype), w3_ref[...], preferred_element_type=jnp.float32)
    return jnp.maximum(h3 + b3_ref[...].astype(jnp.float32), 0.0)


def _make_kernel(emit_logits, emit_labels, packed_rows):
    """Build a kernel emitting logits and/or labels (optionally lane-packed)."""

    def kernel(x_ref, w1_ref, b1_ref, w2_ref, b2_ref, w3_ref, b3_ref, *out_refs):
        h3 = _mlp_compute(x_ref, w1_ref, b1_ref, w2_ref, b2_ref, w3_ref, b3_ref)
        idx = 0
        if emit_logits:
            out_refs[idx][...] = h3.astype(out_refs[idx].dtype)
            idx += 1
        if emit_labels:
            # Matches PyTorch Net.predict on the (post-ReLU) forward output:
            # label 0 iff t[0] > t[1], else 1 (ties -> 1, same as the reference loop).
            lbl = jnp.where(h3[:, 0:1] > h3[:, 1:2], 0, 1).astype(jnp.int32)  # (tile_b, 1)
            if packed_rows is not None:
                # Lane-dense store: (tile_b, 1) -> (tile_b//128, 128). Costs only
                # XLU slots (idle here) and turns masked 1/128-lane stores into
                # full-lane stores + a dense output DMA.
                out_refs[idx][...] = lbl.reshape(packed_rows, 128)
            else:
                out_refs[idx][...] = lbl
        del idx

    return kernel


# ------------------------------------------------------ packed-label capability probe

_PACKED_LABEL_SUPPORT = None


def _packed_labels_supported():
    """One-time check that the (N, 1) -> (N//128, 128) in-kernel reshape lowers
    and is numerically correct on this toolchain; cached for all later calls."""
    global _PACKED_LABEL_SUPPORT
    if _PACKED_LABEL_SUPPORT is None:
        try:
            def probe_kernel(x_ref, o_ref):
                lbl = jnp.where(x_ref[:, 0:1] > x_ref[:, 1:2], 0, 1).astype(jnp.int32)
                o_ref[...] = lbl.reshape(2, 128)

            xp = jnp.stack(
                [jnp.arange(256, dtype=jnp.float32) % 2.0,
                 jnp.full((256,), 0.5, jnp.float32)],
                axis=1,
            )
            got = pl.pallas_call(
                probe_kernel,
                out_shape=jax.ShapeDtypeStruct((2, 128), jnp.int32),
            )(xp)
            want = jnp.where(xp[:, 0] > xp[:, 1], 0, 1).astype(jnp.int32)
            _PACKED_LABEL_SUPPORT = bool(jnp.all(got.reshape(-1) == want))
        except Exception:
            _PACKED_LABEL_SUPPORT = False
    return _PACKED_LABEL_SUPPORT


# ----------------------------------------------------------------------------- wrapper


def _mlp_pallas(x, params, *, want_logits, want_labels,
                tile_b=DEFAULT_TILE_B, core_parallel=False):
    """Shared pallas_call wrapper: batch-tiled streaming, VMEM-resident weights."""
    w1, b1, w2, b2, w3, b3 = params
    B, F = x.shape
    H1, H2, n_out = w1.shape[1], w2.shape[1], w3.shape[1]

    # ---- tile sizing (no jnp.pad anywhere) -----------------------------------
    tile_b = int(tile_b)
    if B <= tile_b:
        # One block covering the whole batch: a full-extent block dim is always
        # legal, and small calls never compute/stream padded rows.
        tile_b = B
    else:
        tile_b = _round_up(tile_b, 8)          # sublane-aligned streaming tiles
    grid_n = pl.cdiv(B, tile_b)                # ragged last block handled by Pallas

    # ---- lane-dense packed label output (when shapes + toolchain allow) ------
    packed_rows = None
    if want_labels and tile_b % 128 == 0:
        rows = tile_b // 128
        # Label block must obey the (8,128) block rule: sublane dim divisible by 8,
        # or equal to the (single-block) full array dim.
        if rows % 8 == 0 or grid_n == 1:
            if _packed_labels_supported():
                packed_rows = rows

    in_specs = [
        # x streamed tile-by-tile (double-buffered DMA overlapped with compute).
        pl.BlockSpec((tile_b, F), lambda i: (i, 0)),
        # Weights/biases: constant block index -> DMA'd once, stay VMEM-resident.
        pl.BlockSpec((F, H1), lambda i: (0, 0)),
        pl.BlockSpec((1, H1), lambda i: (0, 0)),
        pl.BlockSpec((H1, H2), lambda i: (0, 0)),
        pl.BlockSpec((1, H2), lambda i: (0, 0)),
        pl.BlockSpec((H2, n_out), lambda i: (0, 0)),
        pl.BlockSpec((1, n_out), lambda i: (0, 0)),
    ]

    # ---- compiler params: megacore semantics + conditional VMEM limit --------
    def _lane(n):
        return _round_up(n, 128)

    def _sub(n):
        return _round_up(n, 8)

    vmem_est = 2 * tile_b * _lane(F) * x.dtype.itemsize            # x (double-buffered)
    if want_logits:
        vmem_est += 2 * tile_b * _lane(n_out) * 4
    if want_labels:
        if packed_rows is not None:
            vmem_est += 2 * _sub(packed_rows) * 128 * 4
        else:
            vmem_est += 2 * tile_b * _lane(1) * 4
    for p in params:
        vmem_est += 2 * _sub(p.shape[0]) * _lane(p.shape[1]) * p.dtype.itemsize
    # Only override the default scoped limit when blocks get big (v5e default 16 MiB).
    vmem_limit = int(vmem_est) + (4 << 20) if vmem_est > (12 << 20) else None

    # Batch tiles are independent; CORE_PARALLEL shards them across the two v7x
    # TensorCores.  Default "parallel" keeps portability on single-core v5e/v6e.
    dim_sem = (pltpu.CORE_PARALLEL if core_parallel else "parallel",)
    compiler_params = pltpu.CompilerParams(
        dimension_semantics=dim_sem,
        vmem_limit_bytes=vmem_limit,
    )

    param_bytes = sum(int(p.size) * p.dtype.itemsize for p in params)

    def _run(packed_rows):
        out_shapes, out_specs = [], []
        if want_logits:
            out_shapes.append(jax.ShapeDtypeStruct((B, n_out), jnp.float32))
            out_specs.append(pl.BlockSpec((tile_b, n_out), lambda i: (i, 0)))
        if want_labels:
            if packed_rows is not None:
                out_shapes.append(
                    jax.ShapeDtypeStruct((grid_n * packed_rows, 128), jnp.int32))
                out_specs.append(pl.BlockSpec((packed_rows, 128), lambda i: (i, 0)))
            else:
                out_shapes.append(jax.ShapeDtypeStruct((B, 1), jnp.int32))
                out_specs.append(pl.BlockSpec((tile_b, 1), lambda i: (i, 0)))

        out_bytes = (B * n_out * 4 if want_logits else 0) + (B * 4 if want_labels else 0)
        cost = pl.CostEstimate(
            flops=2 * B * (F * H1 + H1 * H2 + H2 * n_out),
            transcendentals=0,
            bytes_accessed=int(x.size) * x.dtype.itemsize + out_bytes + param_bytes,
        )

        return pl.pallas_call(
            _make_kernel(want_logits, want_labels, packed_rows),
            out_shape=tuple(out_shapes),
            grid=(grid_n,),
            in_specs=in_specs,
            out_specs=tuple(out_specs),
            compiler_params=compiler_params,
            cost_estimate=cost,
        )(x, w1, b1, w2, b2, w3, b3)

    if packed_rows is not None:
        try:
            outs = _run(packed_rows)
        except Exception:
            # Shape-specific lowering issue with the packed store -> proven fallback.
            packed_rows = None
            outs = _run(None)
    else:
        outs = _run(None)

    outs = list(outs)
    logits = labels = None
    if want_logits:
        logits = outs.pop(0)
    if want_labels:
        raw = outs.pop(0)
        if packed_rows is not None:
            labels = raw.reshape(-1)[:B]      # tiny (B*4 byte) slice of the dense slab
        else:
            labels = raw[:, 0]
    return logits, labels


# ------------------------------------------------------------------------ entry points


def net_forward(x, params, *, tile_b=DEFAULT_TILE_B, core_parallel=False):
    """Pallas forward pass of Net. x: (B, n_feature) -> (B, 2) f32."""
    logits, _ = _mlp_pallas(x, params, want_logits=True, want_labels=False,
                            tile_b=tile_b, core_parallel=core_parallel)
    return logits


def predict(x, params, *, tile_b=DEFAULT_TILE_B, core_parallel=False):
    """Mirrors Net.predict: 0/1 int32 label per row, fused into the kernel."""
    _, labels = _mlp_pallas(x, params, want_logits=False, want_labels=True,
                            tile_b=tile_b, core_parallel=core_parallel)
    return labels


def net_forward_and_predict(x, params, *, tile_b=DEFAULT_TILE_B, core_parallel=False):
    """Fused: one pass over x emitting both (B, 2) logits and (B,) labels."""
    return _mlp_pallas(x, params, want_logits=True, want_labels=True,
                       tile_b=tile_b, core_parallel=core_parallel)


# ------------------------------------------------------------------- params & reference


def init_params(key, n_feature, n_hidden1, n_hidden2, dtype=jnp.float32):
    """Deterministic PyTorch-style uniform init. Weights stored as (in, out).

    Pass dtype=jnp.bfloat16 to halve HBM traffic on v6e/v7x; the kernel keeps
    f32 accumulation and f32 bias/relu either way.
    """
    def linear_init(key, fan_in, fan_out):
        kw, kb = jax.random.split(key)
        bound = 1.0 / (fan_in ** 0.5)
        w = jax.random.uniform(kw, (fan_in, fan_out), jnp.float32, -bound, bound)
        b = jax.random.uniform(kb, (1, fan_out), jnp.float32, -bound, bound)
        return w.astype(dtype), b.astype(dtype)

    k1, k2, k3 = jax.random.split(key, 3)
    w1, b1 = linear_init(k1, n_feature, n_hidden1)
    w2, b2 = linear_init(k2, n_hidden1, n_hidden2)
    w3, b3 = linear_init(k3, n_hidden2, 2)   # hidden3: Linear(n_hidden2, 2)
    return (w1, b1, w2, b2, w3, b3)


def _reference_forward(x, params):
    """Pure-JAX reference of Net.forward (for testing only)."""
    w1, b1, w2, b2, w3, b3 = (p.astype(jnp.float32) for p in params)
    x = x.astype(jnp.float32)
    h1 = jnp.maximum(x @ w1 + b1, 0.0)
    h2 = jnp.maximum(h1 @ w2 + b2, 0.0)
    return jnp.maximum(h2 @ w3 + b3, 0.0)


# ------------------------------------------------------------------------------- main


if __name__ == "__main__":
    n_feature, n_hidden1, n_hidden2, n_output = 16, 32, 32, 2

    key = jax.random.PRNGKey(0)
    k1, k2, k3, kp = jax.random.split(key, 4)
    params = init_params(kp, n_feature, n_hidden1, n_hidden2)

    # --- tiny batch (B=8): single full block, masked-store label path ---------
    x_small = jax.random.normal(k1, (8, n_feature), jnp.float32)
    out_small = jax.block_until_ready(net_forward(x_small, params))
    assert out_small.shape == (8, 2) and out_small.dtype == jnp.float32
    assert jnp.allclose(out_small, _reference_forward(x_small, params),
                        rtol=5e-3, atol=5e-3)
    lbl_small = jax.block_until_ready(predict(x_small, params))
    assert lbl_small.shape == (8,) and lbl_small.dtype == jnp.int32
    assert bool(jnp.all(
        lbl_small == jnp.where(out_small[:, 0] > out_small[:, 1], 0, 1)))

    # --- B=512: single block, fused logits+labels, lane-packed label store ----
    x_med = jax.random.normal(k2, (512, n_feature), jnp.float32)
    logits_med, labels_med = net_forward_and_predict(x_med, params)
    logits_med, labels_med = jax.block_until_ready((logits_med, labels_med))
    assert logits_med.shape == (512, 2) and labels_med.shape == (512,)
    assert jnp.allclose(logits_med, _reference_forward(x_med, params),
                        rtol=5e-3, atol=5e-3)
    assert bool(jnp.all(
        labels_med == jnp.where(logits_med[:, 0] > logits_med[:, 1], 0, 1)))

    # --- B=2560, tile_b=1024: multi-step grid, ragged last block, packed labels
    x_big = jax.random.normal(k3, (2560, n_feature), jnp.float32)
    logits_big, labels_big = net_forward_and_predict(x_big, params)  # default tile
    logits_big, labels_big = jax.block_until_ready((logits_big, labels_big))
    lbl_tiled = jax.block_until_ready(predict(x_big, params, tile_b=1024))
    assert lbl_tiled.shape == (2560,)
    assert bool(jnp.all(lbl_tiled == labels_big))
    assert bool(jnp.all(
        labels_big == jnp.where(logits_big[:, 0] > logits_big[:, 1], 0, 1)))

    # --- bf16 inputs/weights (HBM-bandwidth lever per review), f32 accumulation
    params_bf16 = tuple(p.astype(jnp.bfloat16) for p in params)
    out_bf16 = jax.block_until_ready(
        net_forward(x_med.astype(jnp.bfloat16), params_bf16))
    assert out_bf16.shape == (512, 2) and out_bf16.dtype == jnp.float32
    assert jnp.allclose(out_bf16, logits_med, rtol=1e-1, atol=1e-1)

    print("KERNEL_OK")
</pallas_src>

<mosaic_0001>
module attributes {stable_mosaic.version = 11 : i64} {
  func.func @kernel(%arg0: i32, %arg1: memref<8x16xf32, #tpu.memory_space<vmem>>, %arg2: memref<16x32xf32, #tpu.memory_space<vmem>>, %arg3: memref<1x32xf32, #tpu.memory_space<vmem>>, %arg4: memref<32x32xf32, #tpu.memory_space<vmem>>, %arg5: memref<1x32xf32, #tpu.memory_space<vmem>>, %arg6: memref<32x2xf32, #tpu.memory_space<vmem>>, %arg7: memref<1x2xf32, #tpu.memory_space<vmem>>, %arg8: memref<8x2xf32, #tpu.memory_space<vmem>>) attributes {dimension_semantics = [#tpu.dimension_semantics<parallel>], iteration_bounds = array<i64: 1>, scalar_prefetch = 0 : i64, scratch_operands = 0 : i64, tpu.core_type = #tpu.core_type<tc>, window_params = [{transform_indices = @transform_0, window_bounds = array<i64: 8, 16>}, {pipeline_mode = #tpu.pipeline_mode<synchronous>, transform_indices = @transform_1, window_bounds = array<i64: 16, 32>}, {pipeline_mode = #tpu.pipeline_mode<synchronous>, transform_indices = @transform_2, window_bounds = array<i64: 1, 32>}, {pipeline_mode = #tpu.pipeline_mode<synchronous>, transform_indices = @transform_3, window_bounds = array<i64: 32, 32>}, {pipeline_mode = #tpu.pipeline_mode<synchronous>, transform_indices = @transform_4, window_bounds = array<i64: 1, 32>}, {pipeline_mode = #tpu.pipeline_mode<synchronous>, transform_indices = @transform_5, window_bounds = array<i64: 32, 2>}, {pipeline_mode = #tpu.pipeline_mode<synchronous>, transform_indices = @transform_6, window_bounds = array<i64: 1, 2>}, {transform_indices = @transform_7, window_bounds = array<i64: 8, 2>}]} {
    %c0 = arith.constant 0 : index
    %c0_0 = arith.constant 0 : index
    %0 = vector.load %arg1[%c0, %c0_0] : memref<8x16xf32, #tpu.memory_space<vmem>>, vector<8x16xf32>
    %c0_1 = arith.constant 0 : index
    %c0_2 = arith.constant 0 : index
    %1 = vector.load %arg2[%c0_1, %c0_2] : memref<16x32xf32, #tpu.memory_space<vmem>>, vector<16x32xf32>
    %cst = arith.constant dense<0.000000e+00> : vector<8x32xf32>
    %2 = tpu.matmul %0, %1, %cst {dimension_numbers = #tpu.dot_dimension_numbers<[1], [0], [0], [1], [0, 0, 1, 1], [], []>} : vector<8x16xf32>, vector<16x32xf32>, vector<8x32xf32> -> vector<8x32xf32>
    %c0_3 = arith.constant 0 : index
    %c0_4 = arith.constant 0 : index
    %3 = vector.load %arg3[%c0_3, %c0_4] : memref<1x32xf32, #tpu.memory_space<vmem>>, vector<1x32xf32>
    %4 = vector.broadcast %3 : vector<1x32xf32> to vector<8x32xf32>
    %5 = arith.addf %2, %4 : vector<8x32xf32>
    %cst_5 = arith.constant 0.000000e+00 : f32
    %6 = vector.broadcast %cst_5 : f32 to vector<8x32xf32>
    %7 = arith.maximumf %5, %6 : vector<8x32xf32>
    %c0_6 = arith.constant 0 : index
    %c0_7 = arith.constant 0 : index
    %8 = vector.load %arg4[%c0_6, %c0_7] : memref<32x32xf32, #tpu.memory_space<vmem>>, vector<32x32xf32>
    %cst_8 = arith.constant dense<0.000000e+00> : vector<8x32xf32>
    %9 = tpu.matmul %7, %8, %cst_8 {dimension_numbers = #tpu.dot_dimension_numbers<[1], [0], [0], [1], [0, 0, 1, 1], [], []>} : vector<8x32xf32>, vector<32x32xf32>, vector<8x32xf32> -> vector<8x32xf32>
    %c0_9 = arith.constant 0 : index
    %c0_10 = arith.constant 0 : index
    %10 = vector.load %arg5[%c0_9, %c0_10] : memref<1x32xf32, #tpu.memory_space<vmem>>, vector<1x32xf32>
    %11 = vector.broadcast %10 : vector<1x32xf32> to vector<8x32xf32>
    %12 = arith.addf %9, %11 : vector<8x32xf32>
    %cst_11 = arith.constant 0.000000e+00 : f32
    %13 = vector.broadcast %cst_11 : f32 to vector<8x32xf32>
    %14 = arith.maximumf %12, %13 : vector<8x32xf32>
    %c0_12 = arith.constant 0 : index
    %c0_13 = arith.constant 0 : index
    %15 = vector.load %arg6[%c0_12, %c0_13] : memref<32x2xf32, #tpu.memory_space<vmem>>, vector<32x2xf32>
    %cst_14 = arith.constant dense<0.000000e+00> : vector<8x2xf32>
    %16 = tpu.matmul %14, %15, %cst_14 {dimension_numbers = #tpu.dot_dimension_numbers<[1], [0], [0], [1], [0, 0, 1, 1], [], []>} : vector<8x32xf32>, vector<32x2xf32>, vector<8x2xf32> -> vector<8x2xf32>
    %c0_15 = arith.constant 0 : index
    %c0_16 = arith.constant 0 : index
    %17 = vector.load %arg7[%c0_15, %c0_16] : memref<1x2xf32, #tpu.memory_space<vmem>>, vector<1x2xf32>
    %18 = vector.broadcast %17 : vector<1x2xf32> to vector<8x2xf32>
    %19 = arith.addf %16, %18 : vector<8x2xf32>
    %cst_17 = arith.constant 0.000000e+00 : f32
    %20 = vector.broadcast %cst_17 : f32 to vector<8x2xf32>
    %21 = arith.maximumf %19, %20 : vector<8x2xf32>
    %c0_18 = arith.constant 0 : index
    %c0_19 = arith.constant 0 : index
    %22 = vector.load %arg8[%c0_18, %c0_19] : memref<8x2xf32, #tpu.memory_space<vmem>>, vector<8x2xf32>
    tpu.vector_store %arg8[%c0_18, %c0_19], %21 {strides = array<i32>} : memref<8x2xf32, #tpu.memory_space<vmem>>, vector<8x2xf32>,
    return
  }
  func.func @transform_0(%arg0: i32) -> (i32, i32) {
    %c0_i32 = arith.constant 0 : i32
    %c0_i32_0 = arith.constant 0 : i32
    return %arg0, %c0_i32 : i32, i32
  }
  func.func @transform_1(%arg0: i32) -> (i32, i32) {
    %c0_i32 = arith.constant 0 : i32
    %c0_i32_0 = arith.constant 0 : i32
    %c0_i32_1 = arith.constant 0 : i32
    return %c0_i32, %c0_i32_0 : i32, i32
  }
  func.func @transform_2(%arg0: i32) -> (i32, i32) {
    %c0_i32 = arith.constant 0 : i32
    %c0_i32_0 = arith.constant 0 : i32
    %c0_i32_1 = arith.constant 0 : i32
    return %c0_i32, %c0_i32_0 : i32, i32
  }
  func.func @transform_3(%arg0: i32) -> (i32, i32) {
    %c0_i32 = arith.constant 0 : i32
    %c0_i32_0 = arith.constant 0 : i32
    %c0_i32_1 = arith.constant 0 : i32
    return %c0_i32, %c0_i32_0 : i32, i32
  }
  func.func @transform_4(%arg0: i32) -> (i32, i32) {
    %c0_i32 = arith.constant 0 : i32
    %c0_i32_0 = arith.constant 0 : i32
    %c0_i32_1 = arith.constant 0 : i32
    return %c0_i32, %c0_i32_0 : i32, i32
  }
  func.func @transform_5(%arg0: i32) -> (i32, i32) {
    %c0_i32 = arith.constant 0 : i32
    %c0_i32_0 = arith.constant 0 : i32
    %c0_i32_1 = arith.constant 0 : i32
    return %c0_i32, %c0_i32_0 : i32, i32
  }
  func.func @transform_6(%arg0: i32) -> (i32, i32) {
    %c0_i32 = arith.constant 0 : i32
    %c0_i32_0 = arith.constant 0 : i32
    %c0_i32_1 = arith.constant 0 : i32
    return %c0_i32, %c0_i32_0 : i32, i32
  }
  func.func @transform_7(%arg0: i32) -> (i32, i32) {
    %c0_i32 = arith.constant 0 : i32
    %c0_i32_0 = arith.constant 0 : i32
    return %arg0, %c0_i32 : i32, i32
  }
}

</mosaic_0001>

<bundles_post_ra>
// kernel: tpu_custom_call.1
= control target key start
LH: loop header
LB: loop body
LE: loop exit
PB: predicated region body
PF: predicated region fallthrough
CT: control target
= control target key end

     0   :  { %12 = vsyncpa [#allocation3], 0  ;;  %s309_s0 = inlined_call_operand.hbm [shape: f32[8,16], index: 0, kind: input, shape index: {}]   ;;  %s310_s1 = inlined_call_operand.hbm [shape: f32[16,32], index: 1, kind: input, shape index: {}]   ;;  %s311_s2 = inlined_call_operand.vmem [shape: f32[1,32], index: 2, kind: input, shape index: {}]   ;;  %s312_s3 = inlined_call_operand.vmem [shape: f32[32,32], index: 3, kind: input, shape index: {}]   ;;  %s313_s4 = inlined_call_operand.vmem [shape: f32[1,32], index: 4, kind: input, shape index: {}]   ;;  %s314_s5 = inlined_call_operand.vmem [shape: f32[32,2], index: 5, kind: input, shape index: {}]   ;;  %s315_s6 = inlined_call_operand.vmem [shape: f32[1,2], index: 6, kind: input, shape index: {}]   ;;  %s316_s7 = inlined_call_operand.vmem [shape: f32[8,2], index: 7, kind: output, shape index: {}]  }
   0x1   :  { %s19_s26 = sshll.u32 %s309_s0, 4  ;;  %s20_s26 = int_to_ptr.hbm [resolvable:$true] %s19_s26 }
   0x2   :  { %13 = vsyncpa [#allocation5], 0  ;;  %s223_s27 = smov [#allocation2]   ;;  %s29_s8 = sshll.u32 %s310_s1, 4  ;;  %s30_s8 = int_to_ptr.hbm [resolvable:$true] %s29_s8 }
   0x3   :  { %s21_s28 = sshll.u32 %s223_s27, 4  ;;  %s224_s9 = smov [#allocation4]   ;;  %s22_s28 = int_to_ptr.vmem [resolvable:$true] %s21_s28 }
   0x4   :  { %24 = dma.hbm_to_vmem [thread:$0]  %s20_s26, 128, %s22_s28, [#allocation3]  }
   0x5   :  { %s31_s10 = sshll.u32 %s224_s9, 4  ;;  %s225_s11 = smov 128   ;;  %s32_s10 = int_to_ptr.vmem [resolvable:$true] %s31_s10 }
   0x6   :  { %s226_s12 = smov 8  }
   0x7   :  { %37 = dma.hbm_to_vmem [thread:$0]  %s30_s8, 256, %s32_s10, [#allocation5], %s225_s11, %s225_s11, %s226_s12  }
   0x8   :  { %219 = dma.done.wait [#allocation3], 128  }
   0x9   :  { %220 = vsyncadd [#allocation3], 4294967168 }
   0xa   :  { %221 = dma.done.wait [#allocation5], 256  }
   0xb   :  { %222 = vsyncadd [#allocation5], 4294967040  ;;  %v58_v0 = vld [vmem:[#allocation4 + $0x8] sm:$0xff]  ;;  %v57_v1 = vld [vmem:[#allocation4] sm:$0xff]  ;;  %vm63_vm0 = vcmask 130048   ;;  %vm96_vm1 = vcmask 261120  }
   0xc   :  { %81 = vmatpush.msra.mxu0 %v58_v0  ;;  %v56_v2 = vld [vmem:[#allocation2] sm:$0xff]  ;;  %v91_v3 = vld [vmem:[%s312_s3 + $0x18] sm:$0xff]  ;;  %v90_v4 = vld [vmem:[%s312_s3 + $0x10] sm:$0xff]  ;;  %vm153_vm2 = vcmask 15360  }
   0xd   :  { %112 = vmatpush.msra.mxu1 %v91_v3  ;;  %v89_v5 = vld [vmem:[%s312_s3 + $0x8] sm:$0xff]  ;;  %v88_v6 = vld [vmem:[%s312_s3] sm:$0xff]  ;;  %v124_v7 = vld [vmem:[%s314_s5 + $0x18] sm:$0xff] }
   0xe   :  { %82 = vmatpush.msra.mxu0 %v57_v1  ;;  %144 = vmatpush.msra.mxu2 %v124_v7  ;;  %v168_v8 = vld [vmem:[%s311_s2] ss:$0 sm:$0xff]  ;;  %v123_v12 = vld [vmem:[%s314_s5 + $0x10] sm:$0xff]  ;;  %v122_v13 = vld [vmem:[%s314_s5 + $0x8] sm:$0xff] }
   0xf   :  { %161 = vmatmul.msk.f32.vlgmr.msra.gmra.mxu0 %vm63_vm0, %v56_v2  ;;  %113 = vmatpush.msra.mxu1 %v90_v4  ;;  %v121_v14 = vld [vmem:[%s314_s5] sm:$0xff] }
  0x10   :  { %145 = vmatpush.msra.mxu2 %v123_v12  ;;  %v169_v15 = vld [vmem:[%s313_s4] ss:$0 sm:$0xff] }
  0x11   :  { %114 = vmatpush.msra.mxu1 %v89_v5  ;;  %v170_v19 = vld [vmem:[%s315_s6] ss:$0 sm:$0xff] }
  0x12   :  { %146 = vmatpush.msra.mxu2 %v122_v13 }
  0x13   :  { %115 = vmatpush.msra.mxu1 %v88_v6 }
  0x14   :  { %147 = vmatpush.msra.mxu2 %v121_v14 }
  0x8c   :  { %v84_v9 = vpop.f32.mrf.mxu0 }
  0x8d   :  { %v85_v10 = vadd.f32 %v168_v8, %v84_v9 }
  0x8f   :  { %v87_v11 = vmax.f32 %v85_v10, 0.0 }
  0x91   :  { %162 = vmatmul.msk.f32.vlgmr.msra.gmra.mxu1 %vm96_vm1, %v87_v11 }
 0x10e   :  { %v117_v16 = vpop.f32.mrf.mxu1 }
 0x10f   :  { %v118_v17 = vadd.f32 %v169_v15, %v117_v16 }
 0x111   :  { %v120_v18 = vmax.f32 %v118_v17, 0.0 }
 0x113   :  { %163 = vmatmul.msk.f32.vlgmr.msra.gmra.mxu2 %vm96_vm1, %v120_v18 }
 0x196   :  { %v149_v20 = vpop.f32.mrf.mxu2 }
 0x197   :  { %v150_v21 = vadd.f32 %v170_v19, %v149_v20 }
 0x199   :  { %v152_v22 = vmax.f32 %v150_v21, 0.0 }
 0x19b   :  { %154 = vst.msk [vmem:[%s316_s7] sm:$0xff] %vm153_vm2, %v152_v22 }
 0x19c   :  { %159 = vsyncpa [#allocation3], 1 }
 0x19d   :  { %160 = vsyncpa [#allocation5], 1 }

</bundles_post_ra>
